<compile_context>
chip_gen: v5e
topology: v5e:2x2
jax: 0.10.0
libtpu: 0.0.40
codegen_flags: <defaults>
</compile_context>

<pallas_src>
import math

import jax
import jax.numpy as jnp
from jax.experimental import pallas as pl
from jax.experimental.pallas import tpu as pltpu

_LANE = 128


def _linear_cd_kernel(x_ref, w_ref, b_ref, o_ref, acc_ref):
    # grid = (batch blocks [parallel], K blocks [arbitrary / reduction])
    k = pl.program_id(1)

    @pl.when(k == 0)
    def _():
        acc_ref[...] = jnp.zeros_like(acc_ref)

    # VPU elementwise multiply (weight tile broadcasts across batch rows),
    # then one sublane reduce per step into the small f32 accumulator.
    prod = x_ref[...].astype(jnp.float32) * w_ref[...].astype(jnp.float32)
    acc_ref[...] += jnp.sum(prod, axis=1)  # (bm, rows, 128) -> (bm, 128)

    @pl.when(k == pl.num_programs(1) - 1)
    def _():
        # Final cross-lane reduce (XLU) + bias, only once per output tile.
        total = jnp.sum(acc_ref[...], axis=1, keepdims=True)  # (bm, 1)
        o_ref[...] = (total + b_ref[0]).astype(o_ref.dtype)


def linear_cd_forward(x, weight, bias, *, batch_block=8, k_block_rows=1024):
    """x: (B, C, H, W); weight: (D,); bias: (1,) -> (B, 1, 1, 1) with D = C*H*W."""
    assert k_block_rows % 8 == 0, "K block rows must respect the 8-sublane tiling"
    B = x.shape[0]
    D = math.prod(x.shape[1:])
    assert weight.shape == (D,)
    assert bias.shape == (1,)

    x_flat = x.reshape(B, D)  # same row-major flatten as torch .view(B, -1)

    # Lane-dense layout: pad D up to a multiple of 128 lanes and view as rows.
    rows = pl.cdiv(D, _LANE)
    if rows <= k_block_rows:
        block_rows = rows                      # whole reduction in one grid step
    else:
        block_rows = k_block_rows              # multiple of 8 (sublane rule)
        rows = pl.cdiv(rows, block_rows) * block_rows
    d_pad = rows * _LANE

    if d_pad != D:
        x_flat = jnp.pad(x_flat, ((0, 0), (0, d_pad - D)))
        w_flat = jnp.pad(weight, (0, d_pad - D))
    else:
        w_flat = weight

    x3 = x_flat.reshape(B, rows, _LANE)
    w3 = w_flat.reshape(1, rows, _LANE)

    bm = min(B, batch_block)
    grid = (pl.cdiv(B, bm), rows // block_rows)

    itemsize = jnp.dtype(x.dtype).itemsize
    bytes_accessed = (B * d_pad + d_pad) * itemsize + (B + 1) * 4

    out2d = pl.pallas_call(
        _linear_cd_kernel,
        out_shape=jax.ShapeDtypeStruct((B, 1), x.dtype),
        grid_spec=pltpu.PrefetchScalarGridSpec(
            num_scalar_prefetch=0,
            grid=grid,
            in_specs=[
                # x tile: lane dim is D (full 128-lane occupancy even at small B)
                pl.BlockSpec((bm, block_rows, _LANE), lambda b, k: (b, k, 0)),
                # lane-dense weight tile, broadcast over batch inside the kernel
                pl.BlockSpec((1, block_rows, _LANE), lambda b, k: (0, k, 0)),
                # bias scalar lives in SMEM
                pl.BlockSpec(memory_space=pltpu.MemorySpace.SMEM),
            ],
            out_specs=pl.BlockSpec((bm, 1), lambda b, k: (b, 0)),
            # Small f32 accumulator: one 128-lane row per batch row.
            scratch_shapes=[pltpu.VMEM((bm, _LANE), jnp.float32)],
        ),
        compiler_params=pltpu.CompilerParams(
            # batch axis parallel (v7x dual-TC), K axis is the reduction
            dimension_semantics=("parallel", "arbitrary"),
        ),
        cost_estimate=pl.CostEstimate(
            flops=2 * B * d_pad,
            transcendentals=0,
            bytes_accessed=bytes_accessed,
        ),
    )(x3, w3, bias)

    return out2d.reshape(B, 1, 1, 1)


def _reference(x, weight, bias):
    B = x.shape[0]
    D = math.prod(x.shape[1:])
    return (jnp.sum(x.reshape(B, D) * weight, axis=1) + bias[0]).reshape(B, 1, 1, 1)


if __name__ == "__main__":
    key = jax.random.PRNGKey(0)
    kx, kw, kb, kx2, kw2, kb2 = jax.random.split(key, 6)

    # Small shapes consistent with the module: input_shape=(3, 16, 16) -> D = 768.
    B, C, H, W = 2, 3, 16, 16
    D = C * H * W
    bound = 1.0 / math.sqrt(D)  # mimic nn.Linear's uniform(-1/sqrt(D), 1/sqrt(D))

    x = jax.random.normal(kx, (B, C, H, W), dtype=jnp.float32)
    weight = jax.random.uniform(kw, (D,), minval=-bound, maxval=bound, dtype=jnp.float32)
    bias = jax.random.uniform(kb, (1,), minval=-bound, maxval=bound, dtype=jnp.float32)

    out = jax.block_until_ready(linear_cd_forward(x, weight, bias))
    ref = _reference(x, weight, bias)
    assert out.shape == (B, 1, 1, 1)
    assert jnp.allclose(out, ref, atol=1e-5, rtol=1e-5)

    # Secondary check: D not a multiple of 128 exercises the zero-padding path.
    C2, H2, W2 = 5, 7, 9  # D = 315
    D2 = C2 * H2 * W2
    x2 = jax.random.normal(kx2, (B, C2, H2, W2), dtype=jnp.float32)
    w2 = jax.random.uniform(kw2, (D2,), minval=-bound, maxval=bound, dtype=jnp.float32)
    b2 = jax.random.uniform(kb2, (1,), minval=-bound, maxval=bound, dtype=jnp.float32)
    out2 = jax.block_until_ready(linear_cd_forward(x2, w2, b2))
    assert jnp.allclose(out2, _reference(x2, w2, b2), atol=1e-5, rtol=1e-5)

    print("KERNEL_OK")
</pallas_src>

<mosaic_0001>
module attributes {stable_mosaic.version = 11 : i64} {
  func.func @_linear_cd_kernel(%arg0: i32, %arg1: i32, %arg2: memref<2x6x128xf32, #tpu.memory_space<vmem>>, %arg3: memref<1x6x128xf32, #tpu.memory_space<vmem>>, %arg4: memref<1xf32, #tpu.memory_space<smem>>, %arg5: memref<2x1xf32, #tpu.memory_space<vmem>>, %arg6: memref<2x128xf32, #tpu.memory_space<vmem>>) attributes {dimension_semantics = [#tpu.dimension_semantics<parallel>, #tpu.dimension_semantics<arbitrary>], iteration_bounds = array<i64: 1, 1>, scalar_prefetch = 0 : i64, scratch_operands = 1 : i64, tpu.core_type = #tpu.core_type<tc>, window_params = [{transform_indices = @transform_0, window_bounds = array<i64: 2, 6, 128>}, {transform_indices = @transform_1, window_bounds = array<i64: 1, 6, 128>}, {transform_indices = @transform_2, window_bounds = array<i64: 1>}, {transform_indices = @transform_3, window_bounds = array<i64: 2, 1>}]} {
    %c0_i32 = arith.constant 0 : i32
    %0 = arith.cmpi eq, %arg1, %c0_i32 : i32
    %1 = arith.extui %0 : i1 to i32
    %c0_i32_0 = arith.constant 0 : i32
    %2 = arith.cmpi ne, %1, %c0_i32_0 : i32
    scf.if %2 {
      %cst_12 = arith.constant 0.000000e+00 : f32
      %14 = vector.broadcast %cst_12 : f32 to vector<2x128xf32>
      %c0_13 = arith.constant 0 : index
      %c0_14 = arith.constant 0 : index
      %15 = vector.load %arg6[%c0_13, %c0_14] : memref<2x128xf32, #tpu.memory_space<vmem>>, vector<2x128xf32>
      tpu.vector_store %arg6[%c0_13, %c0_14], %14 {strides = array<i32>} : memref<2x128xf32, #tpu.memory_space<vmem>>, vector<2x128xf32>,
    } else {
    }
    %c0 = arith.constant 0 : index
    %c0_1 = arith.constant 0 : index
    %c0_2 = arith.constant 0 : index
    %3 = vector.load %arg2[%c0, %c0_1, %c0_2] : memref<2x6x128xf32, #tpu.memory_space<vmem>>, vector<2x6x128xf32>
    %c0_3 = arith.constant 0 : index
    %c0_4 = arith.constant 0 : index
    %c0_5 = arith.constant 0 : index
    %4 = vector.load %arg3[%c0_3, %c0_4, %c0_5] : memref<1x6x128xf32, #tpu.memory_space<vmem>>, vector<1x6x128xf32>
    %5 = vector.broadcast %4 : vector<1x6x128xf32> to vector<2x6x128xf32>
    %6 = arith.mulf %3, %5 : vector<2x6x128xf32>
    %c0_6 = arith.constant 0 : index
    %c0_7 = arith.constant 0 : index
    %7 = vector.load %arg6[%c0_6, %c0_7] : memref<2x128xf32, #tpu.memory_space<vmem>>, vector<2x128xf32>
    %cst = arith.constant dense<0.000000e+00> : vector<2x128xf32>
    %8 = vector.multi_reduction <add>, %6, %cst [1] : vector<2x6x128xf32> to vector<2x128xf32>
    %9 = arith.addf %7, %8 : vector<2x128xf32>
    %c0_8 = arith.constant 0 : index
    %c0_9 = arith.constant 0 : index
    %10 = vector.load %arg6[%c0_8, %c0_9] : memref<2x128xf32, #tpu.memory_space<vmem>>, vector<2x128xf32>
    tpu.vector_store %arg6[%c0_8, %c0_9], %9 {strides = array<i32>} : memref<2x128xf32, #tpu.memory_space<vmem>>, vector<2x128xf32>,
    %c0_i32_10 = arith.constant 0 : i32
    %11 = arith.cmpi eq, %arg1, %c0_i32_10 : i32
    %12 = arith.extui %11 : i1 to i32
    %c0_i32_11 = arith.constant 0 : i32
    %13 = arith.cmpi ne, %12, %c0_i32_11 : i32
    scf.if %13 {
      %c0_12 = arith.constant 0 : index
      %c0_13 = arith.constant 0 : index
      %14 = vector.load %arg6[%c0_12, %c0_13] : memref<2x128xf32, #tpu.memory_space<vmem>>, vector<2x128xf32>
      %cst_14 = arith.constant dense<0.000000e+00> : vector<2xf32>
      %15 = vector.multi_reduction <add>, %14, %cst_14 [1] : vector<2x128xf32> to vector<2xf32>
      %16 = vector.shape_cast %15 : vector<2xf32> to vector<2x1xf32>
      %c0_15 = arith.constant 0 : index
      %17 = memref.load %arg4[%c0_15] : memref<1xf32, #tpu.memory_space<smem>>
      %18 = vector.broadcast %17 : f32 to vector<2x1xf32>
      %19 = arith.addf %16, %18 : vector<2x1xf32>
      %c0_16 = arith.constant 0 : index
      %c0_17 = arith.constant 0 : index
      %20 = vector.load %arg5[%c0_16, %c0_17] : memref<2x1xf32, #tpu.memory_space<vmem>>, vector<2x1xf32>
      tpu.vector_store %arg5[%c0_16, %c0_17], %19 {strides = array<i32>} : memref<2x1xf32, #tpu.memory_space<vmem>>, vector<2x1xf32>,
    } else {
    }
    return
  }
  func.func @transform_0(%arg0: i32, %arg1: i32) -> (i32, i32, i32) {
    %c0_i32 = arith.constant 0 : i32
    %c0_i32_0 = arith.constant 0 : i32
    return %arg0, %arg1, %c0_i32 : i32, i32, i32
  }
  func.func @transform_1(%arg0: i32, %arg1: i32) -> (i32, i32, i32) {
    %c0_i32 = arith.constant 0 : i32
    %c0_i32_0 = arith.constant 0 : i32
    %c0_i32_1 = arith.constant 0 : i32
    return %c0_i32, %arg1, %c0_i32_0 : i32, i32, i32
  }
  func.func @transform_2(%arg0: i32, %arg1: i32) -> i32 {
    %c0_i32 = arith.constant 0 : i32
    %c0_i32_0 = arith.constant 0 : i32
    return %c0_i32 : i32
  }
  func.func @transform_3(%arg0: i32, %arg1: i32) -> (i32, i32) {
    %c0_i32 = arith.constant 0 : i32
    %c0_i32_0 = arith.constant 0 : i32
    return %arg0, %c0_i32 : i32, i32
  }
}

</mosaic_0001>

<bundles_post_ra>
// kernel: tpu_custom_call.1
= control target key start
LH: loop header
LB: loop body
LE: loop exit
PB: predicated region body
PF: predicated region fallthrough
CT: control target
= control target key end

     0   :  { %v66_v0 = vmov 0.0   ;;  %vm26_vm0 = vcmask 1045504   ;;  %vm43_vm1 = vcmask 1041409   ;;  %vm52_vm2 = vcmask 1041408   ;;  %s102_s0 = inlined_call_operand.vmem [shape: f32[2,6,128], index: 0, kind: input, shape index: {}]   ;;  %s103_s1 = inlined_call_operand.vmem [shape: f32[1,6,128], index: 1, kind: input, shape index: {}]   ;;  %s104_s2 = inlined_call_operand.<no memory space> [shape: f32[1], index: 2, kind: input, shape index: {}]   ;;  %s105_s3 = inlined_call_operand.vmem [shape: f32[2,1], index: 3, kind: output, shape index: {}]  }
   0x1   :  { %19 = vst [vmem:[#allocation2] sm:$0x3] %v66_v0  ;;  %v20_v1 = vld [vmem:[%s102_s0] sm:$0x3f]  ;;  %v21_v2 = vld [vmem:[%s102_s0 + $0x8] sm:$0x3f]  ;;  %v57_v25 = vstv %s104_s2 }
   0x2   :  { %v22_v3 = vld [vmem:[%s103_s1] sm:$0x3f]  ;;  %vm59_vm3 = vcmask 1024  }
   0x3   :  { %v23_v4 = vmul.f32 %v22_v3, %v20_v1  ;;  %v24_v5 = vmul.f32 %v22_v3, %v21_v2 }
   0x5   :  { %v27_v6 = vsel %vm26_vm0, %v23_v4, 0.0  ;;  %v34_v7 = vsel %vm26_vm0, %v24_v5, 0.0 }
   0x6   :  { %v28_v8 = vrot.slane %v27_v6, 4  ;;  %v35_v9 = vrot.slane %v34_v7, 4 }
   0x8   :  { %v29_v10 = vadd.f32 %v28_v8, %v27_v6  ;;  %v36_v11 = vadd.f32 %v35_v9, %v34_v7  ;;  %v25_v18 = vld [vmem:[#allocation2] sm:$0x3] }
   0xa   :  { %v30_v12 = vrot.slane %v29_v10, 2  ;;  %v37_v13 = vrot.slane %v36_v11, 2 }
   0xc   :  { %v31_v14 = vadd.f32 %v30_v12, %v29_v10  ;;  %v38_v15 = vadd.f32 %v37_v13, %v36_v11 }
   0xe   :  { %v32_v16 = vrot.slane %v31_v14, 1  ;;  %v39_v17 = vrot.slane %v38_v15, 1 }
  0x10   :  { %v33_v19 = vadd.f32 %v32_v16, %v31_v14  ;;  %v40_v20 = vadd.f32 %v39_v17, %v38_v15 }
  0x12   :  { %v44_v21 = vsel %vm43_vm1, %v40_v20, %v33_v19 }
  0x13   :  { %v46_v22 = vadd.f32 %v44_v21, %v25_v18 }
  0x15   :  { %47 = vst [vmem:[#allocation2] sm:$0x3] %v46_v22 }
  0x1c   :  { %v51_v23 = vld [vmem:[#allocation2] sm:$0x3] }
  0x1d   :  { %v53_v24 = vsel %vm52_vm2, %v51_v23, 0.0 }
  0x1e   :  { %54 = vadd.xlane.f32.xlu0 %v53_v24 }
  0x91   :  { %v55_v26 = vpop.xlane.xlu0 %54 }
  0x92   :  { %v58_v27 = vadd.f32 %v57_v25, %v55_v26 }
  0x94   :  { %60 = vst.msk [vmem:[%s105_s3] sm:$0x3] %vm59_vm3, %v58_v27 }

</bundles_post_ra>
